<compile_context>
chip_gen: v7x
topology: tpu7x:2x2x1
jax: 0.10.0
libtpu: 0.0.40
codegen_flags: <defaults>
</compile_context>

<pallas_src>
import jax
import jax.numpy as jnp
from jax import lax
from jax.experimental import pallas as pl
from jax.experimental.pallas import tpu as pltpu


_VOCAB_CHUNK = 256       # rows of one-hot processed per fori_loop step (mult of 8 & 128)
_MAX_FUSED_ROWS = 2048   # per-table vocab cap for the fused (one-hot) gather path
_FUSED_ROW_TILE = 512    # smaller batch tile for the fused path (one-hot scales with TB)


def _round_up(x, m):
    return -(-int(x) // m) * m


def _vmem_capacity_bytes():
    """Generation-aware VMEM capacity; conservative fallback if unqueryable."""
    try:
        return int(pltpu.get_tpu_info().vmem_capacity_bytes)
    except Exception:
        return 64 << 20   # v7x per-TensorCore VMEM (smallest current generation)


def _vmem_budgets():
    """(scoped vmem limit for the fused call, budget the fused estimate must fit)."""
    cap = _vmem_capacity_bytes()
    vmem_limit = int(min(0.75 * cap, 96 << 20))   # ~48 MiB on v7x, ~96 MiB on v5e/v6e
    return vmem_limit, int(0.6 * vmem_limit)


def _choose_row_tile(batch, cap):
    """Pad batch to a multiple of 8 and pick a sublane tile (multiple of 8)."""
    b_pad = _round_up(batch, 8)
    tb = max(8, (min(cap, b_pad) // 8) * 8)
    # Prefer >= 2 grid steps so both of v7x's TensorCores get work.
    if b_pad // tb < 2 and b_pad >= 16:
        tb = max(8, (b_pad // 2 // 8) * 8)
    b_pad = _round_up(b_pad, tb)
    return b_pad, tb


def _pregathered_row_cap(d):
    # ~2 MiB of lane-padded VMEM per input block; x2 inputs x2 buffers ~ 8 MiB.
    return max(8, min(4096, (2 << 20) // (4 * _round_up(d, 128))))


def _fused_vmem_estimate(n_user_pad, n_item_pad, d, tb):
    """VMEM needed by the fused path, incl. one-hot intermediates & double buffers."""
    d_ln = _round_up(d, 128)          # lane padding of the D axis
    lane1 = 128                       # (x, 1) blocks pad their lane dim to 128
    table_vmem = (n_user_pad + n_item_pad) * d_ln * 4
    idx_vmem = 2 * 2 * tb * lane1 * 4            # two index inputs, double buffered
    out_vmem = 2 * tb * lane1 * 4
    acc_vmem = 2 * tb * d_ln * 4                 # gathered P_u / Q_i accumulators
    onehot_vmem = 3 * tb * _VOCAB_CHUNK * 4      # iota + compare + f32 one-hot (live)
    w_vmem = 2 * 8 * d_ln * 4
    # Resident table blocks are still double-buffered by the default pipeline
    # even though their index_map is constant -> count them twice.
    # TODO(synk): mark the table/weight specs pipeline_mode=pl.Buffered(1)
    # (single buffer for constant blocks) once reliably supported; halves this.
    return 2 * table_vmem + idx_vmem + out_vmem + acc_vmem + onehot_vmem + w_vmem


def _select_fused(n_user, n_item, d, batch, fused_budget):
    """Fused path only when vocab is small, traffic favors it, and VMEM fits."""
    n_user_pad = _round_up(n_user, _VOCAB_CHUNK)
    n_item_pad = _round_up(n_item, _VOCAB_CHUNK)
    if max(n_user_pad, n_item_pad) > _MAX_FUSED_ROWS:
        return False
    # Traffic gate: resident tables must cost less HBM than materializing the
    # XLA gather (~gather-write + kernel re-read of 2*B*D*4 bytes).
    table_bytes = (n_user_pad + n_item_pad) * d * 4
    gathered_bytes = 2 * batch * d * 4
    if table_bytes > 4 * gathered_bytes:
        return False
    _, tb = _choose_row_tile(batch, _FUSED_ROW_TILE)
    return _fused_vmem_estimate(n_user_pad, n_item_pad, d, tb) <= fused_budget


# --------------------------------------------------------------------------- #
# Kernels
# --------------------------------------------------------------------------- #
def _gmf_fused_kernel(u_idx_ref, i_idx_ref, tab_u_ref, tab_i_ref, w_ref, b_ref,
                      o_ref):
    # u_idx_ref / i_idx_ref : (TB, 1) int32        VMEM index tiles
    # tab_u_ref             : (n_user_pad, D) f32  VMEM, resident across grid
    # tab_i_ref             : (n_item_pad, D) f32  VMEM, resident across grid
    # w_ref                 : (1, D) f32           VMEM, resident
    # b_ref                 : (1,)  f32            SMEM scalar
    # o_ref                 : (TB, 1) f32          output tile
    tb = u_idx_ref.shape[0]
    d = tab_u_ref.shape[1]

    def gather_rows(tab_ref, idx):                      # idx: (TB, 1) int32
        n_chunks = tab_ref.shape[0] // _VOCAB_CHUNK

        def body(c, acc):
            start = pl.multiple_of(c * _VOCAB_CHUNK, _VOCAB_CHUNK)
            cols = (lax.broadcasted_iota(jnp.int32, (tb, _VOCAB_CHUNK), 1)
                    + c * _VOCAB_CHUNK)
            onehot = (cols == idx).astype(jnp.float32)  # (TB, CHUNK) bounded temp
            # HIGHEST precision keeps the one-hot selection bit-exact in f32
            # (DEFAULT would round the gathered embeddings to bf16).
            return acc + jnp.dot(onehot,
                                 tab_ref[pl.ds(start, _VOCAB_CHUNK), :],
                                 preferred_element_type=jnp.float32,
                                 precision=lax.Precision.HIGHEST)

        return lax.fori_loop(0, n_chunks, body,
                             jnp.zeros((tb, d), jnp.float32))

    p_u = gather_rows(tab_u_ref, u_idx_ref[...])        # (TB, D)
    q_i = gather_rows(tab_i_ref, i_idx_ref[...])        # (TB, D)

    prod = p_u * q_i * w_ref[...]                       # VPU
    logits = jnp.sum(prod, axis=1, keepdims=True) + b_ref[0]
    o_ref[...] = jax.nn.sigmoid(logits).astype(o_ref.dtype)


def _gmf_rows_kernel(pu_ref, qi_ref, w_ref, b_ref, o_ref):
    # pu_ref / qi_ref : (TB, D) f32 row-major pre-gathered embeddings
    # w_ref           : (1, D) f32 ; b_ref : (1,) SMEM ; o_ref : (TB, 1)
    prod = pu_ref[...] * qi_ref[...] * w_ref[...]
    logits = jnp.sum(prod, axis=1, keepdims=True) + b_ref[0]
    o_ref[...] = jax.nn.sigmoid(logits).astype(o_ref.dtype)


# --------------------------------------------------------------------------- #
# Forward
# --------------------------------------------------------------------------- #
def gmf_forward(user, item, binary, params):
    """Pallas-backed GMF forward. `binary` is unused, mirroring the PyTorch module."""
    del binary
    embed_u = params["embed_u"].astype(jnp.float32)     # (n_user, D)
    embed_i = params["embed_i"].astype(jnp.float32)     # (n_item, D)
    w = params["H_w"]                                   # (D, 1) = PyTorch H.weight.T
    b = params["H_b"]                                   # (1,)

    n_user, d = embed_u.shape
    n_item = embed_i.shape[0]
    batch = int(user.shape[0])

    w_row = jnp.reshape(w, (1, d)).astype(jnp.float32)
    b_vec = jnp.reshape(b, (1,)).astype(jnp.float32)

    vmem_limit, fused_budget = _vmem_budgets()

    if _select_fused(n_user, n_item, d, batch, fused_budget):
        # ---- fused in-kernel gather (small vocabularies) -------------------
        n_user_pad = _round_up(n_user, _VOCAB_CHUNK)
        n_item_pad = _round_up(n_item, _VOCAB_CHUNK)
        b_pad, tb = _choose_row_tile(batch, _FUSED_ROW_TILE)

        u_idx = jnp.pad(user.astype(jnp.int32), (0, b_pad - batch)).reshape(b_pad, 1)
        i_idx = jnp.pad(item.astype(jnp.int32), (0, b_pad - batch)).reshape(b_pad, 1)
        tab_u = jnp.pad(embed_u, ((0, n_user_pad - n_user), (0, 0)))
        tab_i = jnp.pad(embed_i, ((0, n_item_pad - n_item), (0, 0)))

        out = pl.pallas_call(
            _gmf_fused_kernel,
            out_shape=jax.ShapeDtypeStruct((b_pad, 1), jnp.float32),
            grid=(b_pad // tb,),
            in_specs=[
                pl.BlockSpec((tb, 1), lambda i: (i, 0)),              # user idx
                pl.BlockSpec((tb, 1), lambda i: (i, 0)),              # item idx
                pl.BlockSpec((n_user_pad, d), lambda i: (0, 0)),      # table u (resident)
                pl.BlockSpec((n_item_pad, d), lambda i: (0, 0)),      # table i (resident)
                pl.BlockSpec((1, d), lambda i: (0, 0)),               # H weight row
                pl.BlockSpec(memory_space=pltpu.MemorySpace.SMEM),    # bias scalar
            ],
            out_specs=pl.BlockSpec((tb, 1), lambda i: (i, 0)),
            compiler_params=pltpu.CompilerParams(
                dimension_semantics=("parallel",),
                vmem_limit_bytes=vmem_limit),
            cost_estimate=pl.CostEstimate(
                flops=2 * b_pad * d * (n_user_pad + n_item_pad) + 4 * b_pad * d,
                transcendentals=b_pad,
                bytes_accessed=4 * (d * (n_user_pad + n_item_pad)
                                    + 3 * b_pad + d + 1)),
        )(u_idx, i_idx, tab_u, tab_i, w_row, b_vec)
    else:
        # ---- pregathered path: row-major XLA gather, no transposes ---------
        # TODO(synk): for huge vocabularies where fusion would still pay off,
        # replace this with an in-kernel scalar-prefetch + per-row
        # pltpu.make_async_copy gather from a memory_space=pl.ANY table.
        b_pad, tb = _choose_row_tile(batch, _pregathered_row_cap(d))
        u_idx = jnp.pad(user.astype(jnp.int32), (0, b_pad - batch))
        i_idx = jnp.pad(item.astype(jnp.int32), (0, b_pad - batch))
        p_u = embed_u[u_idx]                              # (b_pad, D) row-major
        q_i = embed_i[i_idx]                              # (b_pad, D) row-major

        out = pl.pallas_call(
            _gmf_rows_kernel,
            out_shape=jax.ShapeDtypeStruct((b_pad, 1), jnp.float32),
            grid=(b_pad // tb,),
            in_specs=[
                pl.BlockSpec((tb, d), lambda i: (i, 0)),
                pl.BlockSpec((tb, d), lambda i: (i, 0)),
                pl.BlockSpec((1, d), lambda i: (0, 0)),
                pl.BlockSpec(memory_space=pltpu.MemorySpace.SMEM),
            ],
            out_specs=pl.BlockSpec((tb, 1), lambda i: (i, 0)),
            compiler_params=pltpu.CompilerParams(
                dimension_semantics=("parallel",),
                vmem_limit_bytes=32 << 20),
            cost_estimate=pl.CostEstimate(
                flops=4 * b_pad * d,
                transcendentals=b_pad,
                bytes_accessed=4 * (2 * b_pad * d + b_pad + d + 1)),
        )(p_u, q_i, w_row, b_vec)

    return out[:batch]                                    # (B, 1)


# --------------------------------------------------------------------------- #
# Params / reference / demo
# --------------------------------------------------------------------------- #
def init_params(key, n_user, n_item, embed_dim):
    """Deterministic parameter init matching the PyTorch module's shapes."""
    k1, k2, k3, k4 = jax.random.split(key, 4)
    embed_u = jax.random.normal(k1, (n_user, embed_dim), dtype=jnp.float32)
    embed_i = jax.random.normal(k2, (n_item, embed_dim), dtype=jnp.float32)
    bound = 1.0 / float(embed_dim) ** 0.5
    h_w = jax.random.uniform(k3, (embed_dim, 1), minval=-bound, maxval=bound,
                             dtype=jnp.float32)
    h_b = jax.random.uniform(k4, (1,), minval=-bound, maxval=bound,
                             dtype=jnp.float32)
    return {"embed_u": embed_u, "embed_i": embed_i, "H_w": h_w, "H_b": h_b}


def _reference(user, item, params):
    p_u = params["embed_u"][user]
    q_i = params["embed_i"][item]
    logits = jnp.dot(p_u * q_i, params["H_w"],
                     precision=lax.Precision.HIGHEST) + params["H_b"]
    return jax.nn.sigmoid(logits)


if __name__ == "__main__":
    key = jax.random.PRNGKey(0)
    gmf = jax.jit(gmf_forward)
    _, fused_budget = _vmem_budgets()

    # Case 1: tiny batch -> traffic gate picks the pregathered row-major path.
    n_user, n_item, d, batch = 64, 100, 32, 8
    kp, ku, ki, key = jax.random.split(key, 4)
    params = init_params(kp, n_user, n_item, d)
    user = jax.random.randint(ku, (batch,), 0, n_user, dtype=jnp.int32)
    item = jax.random.randint(ki, (batch,), 0, n_item, dtype=jnp.int32)
    binary = jnp.ones((batch,), jnp.float32)              # unused by forward()
    assert not _select_fused(n_user, n_item, d, batch, fused_budget)
    out1 = jax.block_until_ready(gmf(user, item, binary, params))
    ref1 = _reference(user, item, params)
    assert out1.shape == (batch, 1)
    assert jnp.allclose(out1, ref1, atol=1e-5, rtol=1e-5)

    # Case 2: larger batch, small vocab -> fused chunked in-kernel gather path.
    n_user2, n_item2, d2, batch2 = 300, 500, 32, 512
    kp2, ku2, ki2, key = jax.random.split(key, 4)
    params2 = init_params(kp2, n_user2, n_item2, d2)
    user2 = jax.random.randint(ku2, (batch2,), 0, n_user2, dtype=jnp.int32)
    item2 = jax.random.randint(ki2, (batch2,), 0, n_item2, dtype=jnp.int32)
    binary2 = jnp.ones((batch2,), jnp.float32)
    assert _select_fused(n_user2, n_item2, d2, batch2, fused_budget)
    out2 = jax.block_until_ready(gmf(user2, item2, binary2, params2))
    ref2 = _reference(user2, item2, params2)
    assert out2.shape == (batch2, 1)
    assert jnp.allclose(out2, ref2, atol=1e-5, rtol=1e-5)

    print("KERNEL_OK")
</pallas_src>

<mosaic_0001>
module attributes {stable_mosaic.version = 11 : i64} {
  func.func @_gmf_rows_kernel(%arg0: i32, %arg1: memref<8x32xf32, #tpu.memory_space<vmem>>, %arg2: memref<8x32xf32, #tpu.memory_space<vmem>>, %arg3: memref<1x32xf32, #tpu.memory_space<vmem>>, %arg4: memref<1xf32, #tpu.memory_space<smem>>, %arg5: memref<8x1xf32, #tpu.memory_space<vmem>>) attributes {dimension_semantics = [#tpu.dimension_semantics<parallel>], iteration_bounds = array<i64: 1>, scalar_prefetch = 0 : i64, scratch_operands = 0 : i64, tpu.core_type = #tpu.core_type<tc>, window_params = [{transform_indices = @transform_0, window_bounds = array<i64: 8, 32>}, {transform_indices = @transform_1, window_bounds = array<i64: 8, 32>}, {pipeline_mode = #tpu.pipeline_mode<synchronous>, transform_indices = @transform_2, window_bounds = array<i64: 1, 32>}, {transform_indices = @transform_3, window_bounds = array<i64: 1>}, {transform_indices = @transform_4, window_bounds = array<i64: 8, 1>}]} {
    %c0 = arith.constant 0 : index
    %c0_0 = arith.constant 0 : index
    %0 = vector.load %arg1[%c0, %c0_0] : memref<8x32xf32, #tpu.memory_space<vmem>>, vector<8x32xf32>
    %c0_1 = arith.constant 0 : index
    %c0_2 = arith.constant 0 : index
    %1 = vector.load %arg2[%c0_1, %c0_2] : memref<8x32xf32, #tpu.memory_space<vmem>>, vector<8x32xf32>
    %2 = arith.mulf %0, %1 : vector<8x32xf32>
    %c0_3 = arith.constant 0 : index
    %c0_4 = arith.constant 0 : index
    %3 = vector.load %arg3[%c0_3, %c0_4] : memref<1x32xf32, #tpu.memory_space<vmem>>, vector<1x32xf32>
    %4 = vector.broadcast %3 : vector<1x32xf32> to vector<8x32xf32>
    %5 = arith.mulf %2, %4 : vector<8x32xf32>
    %cst = arith.constant dense<0.000000e+00> : vector<8xf32>
    %6 = vector.multi_reduction <add>, %5, %cst [1] : vector<8x32xf32> to vector<8xf32>
    %7 = vector.shape_cast %6 : vector<8xf32> to vector<8x1xf32>
    %c0_5 = arith.constant 0 : index
    %8 = memref.load %arg4[%c0_5] : memref<1xf32, #tpu.memory_space<smem>>
    %9 = vector.broadcast %8 : f32 to vector<8x1xf32>
    %10 = arith.addf %7, %9 : vector<8x1xf32>
    %11 = arith.negf %10 : vector<8x1xf32>
    %12 = math.exp %11 : vector<8x1xf32>
    %cst_6 = arith.constant 1.000000e+00 : f32
    %13 = vector.broadcast %cst_6 : f32 to vector<8x1xf32>
    %14 = arith.addf %13, %12 : vector<8x1xf32>
    %15 = arith.divf %13, %14 : vector<8x1xf32>
    %c0_7 = arith.constant 0 : index
    %c0_8 = arith.constant 0 : index
    %16 = vector.load %arg5[%c0_7, %c0_8] : memref<8x1xf32, #tpu.memory_space<vmem>>, vector<8x1xf32>
    tpu.vector_store %arg5[%c0_7, %c0_8], %15 {strides = array<i32>} : memref<8x1xf32, #tpu.memory_space<vmem>>, vector<8x1xf32>,
    return
  }
  func.func @transform_0(%arg0: i32) -> (i32, i32) {
    %c0_i32 = arith.constant 0 : i32
    %c0_i32_0 = arith.constant 0 : i32
    return %arg0, %c0_i32 : i32, i32
  }
  func.func @transform_1(%arg0: i32) -> (i32, i32) {
    %c0_i32 = arith.constant 0 : i32
    %c0_i32_0 = arith.constant 0 : i32
    return %arg0, %c0_i32 : i32, i32
  }
  func.func @transform_2(%arg0: i32) -> (i32, i32) {
    %c0_i32 = arith.constant 0 : i32
    %c0_i32_0 = arith.constant 0 : i32
    %c0_i32_1 = arith.constant 0 : i32
    return %c0_i32, %c0_i32_0 : i32, i32
  }
  func.func @transform_3(%arg0: i32) -> i32 {
    %c0_i32 = arith.constant 0 : i32
    %c0_i32_0 = arith.constant 0 : i32
    return %c0_i32 : i32
  }
  func.func @transform_4(%arg0: i32) -> (i32, i32) {
    %c0_i32 = arith.constant 0 : i32
    %c0_i32_0 = arith.constant 0 : i32
    return %arg0, %c0_i32 : i32, i32
  }
}

</mosaic_0001>

<bundles_post_ra>
// kernel: gmf_forward.1
= control target key start
LH: loop header
LB: loop body
LE: loop exit
PB: predicated region body
PF: predicated region fallthrough
CT: control target
= control target key end

     0   :  { %vm29_vm0 = vcmask 261120   ;;  %vm42_vm1 = vcmask 7168   ;;  %s94_s0 = inlined_call_operand.vmem [shape: f32[8,32], index: 0, kind: input, shape index: {}]   ;;  %s95_s1 = inlined_call_operand.vmem [shape: f32[8,32], index: 1, kind: input, shape index: {}]   ;;  %s96_s2 = inlined_call_operand.vmem [shape: f32[1,32], index: 2, kind: input, shape index: {}]   ;;  %s97_s3 = inlined_call_operand.<no memory space> [shape: f32[1], index: 3, kind: input, shape index: {}]   ;;  %s98_s4 = inlined_call_operand.vmem [shape: f32[8,1], index: 4, kind: output, shape index: {}]  }
   0x1   :  { %v18_v0 = vld [vmem:[%s94_s0] sm:$0xff]  ;;  %v34_v6 = vstv %s97_s3 }
   0x2   :  { %v19_v1 = vld [vmem:[%s95_s1] sm:$0xff] }
   0x3   :  { %v48_v2 = vld [vmem:[%s96_s2] ss:$0 sm:$0xff]  ;;  %v20_v3 = vmul.f32 %v19_v1, %v18_v0 }
   0x5   :  { %v28_v4 = vmul.f32 %v48_v2, %v20_v3 }
   0x7   :  { %v30_v5 = vsel %vm29_vm0, %v28_v4, 0.0 }
   0x8   :  { %31 = vadd.xlane.f32.xlu0 %v30_v5 }
  0x95   :  { %v32_v7 = vpop.xlane.xlu0 %31 }
  0x96   :  { %v35_v8 = vadd.f32 %v34_v6, %v32_v7 }
  0x98   :  { %v49_v9 = vmul.f32 -1.442695, %v35_v8 }
  0x9a   :  { %50 = vpow2.f32 %v49_v9 }
  0xa4   :  { %v51_v10 = vpop.eup %50 }
  0xa5   :  { %v39_v11 = vadd.f32 1.0, %v51_v10 }
  0xa7   :  { %52 = vrcp.f32 %v39_v11 }
  0xb1   :  { %v53_v12 = vpop.eup %52 }
  0xb2   :  { %43 = vst.msk [vmem:[%s98_s4] sm:$0xff] %vm42_vm1, %v53_v12 }

</bundles_post_ra>
